<compile_context>
chip_gen: v6e
topology: v6e:2x2x1
jax: 0.10.0
libtpu: 0.0.40
codegen_flags: <defaults>
</compile_context>

<pallas_src>
import functools

import jax
import jax.numpy as jnp
from jax.experimental import pallas as pl
from jax.experimental.pallas import tpu as pltpu


def _round_up(a, b):
    return (a + b - 1) // b * b


def _soft_dice_kernel(lab_ref, x_ref, tp_ref, den_ref, *, has_pad):
    j = pl.program_id(1)

    @pl.when(j == 0)
    def _init():
        tp_ref[...] = jnp.zeros_like(tp_ref)
        den_ref[...] = jnp.zeros_like(den_ref)

    x = x_ref[0].astype(jnp.float32)        # (C, Ts, 128) logits, f32 compute
    lab = lab_ref[0, 0]                     # (Ts, 128) int32 labels (-1 == padding)
    C = x.shape[0]

    # Channel (dim=1 of NCHW) softmax. The channel axis is the major axis, so
    # these reductions are C-1 elementwise max/adds over full-density vregs.
    m = jnp.max(x, axis=0, keepdims=True)           # (1, Ts, 128)
    e = jnp.exp(x - m)                              # (C, Ts, 128)  EUP
    s = jnp.sum(e, axis=0, keepdims=True)           # (1, Ts, 128)
    p = e * pl.reciprocal(s, approx=True)           # EUP recip + VPU mul

    # One-hot target rebuilt from the integer label plane (all-zero on padding).
    ch = jax.lax.broadcasted_iota(jnp.int32, x.shape, 0)
    y = (ch == lab[None]).astype(jnp.float32)       # (C, Ts, 128)

    if has_pad:
        # Padded columns must not contribute to sum(p); tp is already safe (y=0).
        p_den = jnp.where(lab[None] >= 0, p, 0.0)
    else:
        p_den = p

    # Per-channel partial sums collapsed over the sublane-tile axis only, so the
    # resident accumulators / output stores stay lane-dense (128 wide).
    tp_ref[0] += jnp.sum(p * y, axis=1)             # (C, 128)
    den_ref[0] += jnp.sum(p_den + y, axis=1)        # (C, 128)


def soft_dice_loss(x, labels, weight, *, smooth=1.0,
                   max_sublane_tile=1024, vmem_input_budget=8 * 1024 * 1024):
    """x: (N, C, H, W) logits (any float dtype). labels: (N, H, W) integer class map.
    weight: (2,) float array. Returns the scalar SoftDiceLoss."""
    N, C, H, W = x.shape
    L = H * W
    isz = jnp.dtype(x.dtype).itemsize

    # Sublane-tile cap: as large as the (double-buffered) VMEM input budget allows.
    cap = vmem_input_budget // (2 * 128 * (C * isz + 4))
    cap = max(8, min(max_sublane_tile, cap) // 8 * 8)

    Lp = _round_up(L, 128)
    Lps = Lp // 128
    if Lps <= cap:
        ts = Lps                         # full spatial extent in one tile
    else:
        ts = 0
        for d in range(cap, 7, -8):      # largest 8-multiple divisor <= cap
            if Lps % d == 0:
                ts = d
                break
        if ts == 0:                      # no aligned divisor -> pad further
            Lp = _round_up(L, cap * 128)
            Lps = Lp // 128
            ts = cap
    has_pad = Lp != L

    xr = x.reshape(N, C, L)                               # free reshape, no transpose
    lab = labels.reshape(N, 1, L).astype(jnp.int32)
    if has_pad:                                           # only when H*W is ragged
        xr = jnp.pad(xr, ((0, 0), (0, 0), (0, Lp - L)))
        lab = jnp.pad(lab, ((0, 0), (0, 0), (0, Lp - L)), constant_values=-1)
    xr = xr.reshape(N, C, Lps, 128)                       # free split of the minor axis
    lab = lab.reshape(N, 1, Lps, 128)

    grid = (N, Lps // ts)
    kernel = functools.partial(_soft_dice_kernel, has_pad=has_pad)

    tp_part, den_part = pl.pallas_call(
        kernel,
        out_shape=(
            jax.ShapeDtypeStruct((N, C, 128), jnp.float32),
            jax.ShapeDtypeStruct((N, C, 128), jnp.float32),
        ),
        grid_spec=pltpu.PrefetchScalarGridSpec(
            num_scalar_prefetch=0,
            grid=grid,
            in_specs=[
                pl.BlockSpec((1, 1, ts, 128), lambda n, j: (n, 0, j, 0)),   # label tile
                pl.BlockSpec((1, C, ts, 128), lambda n, j: (n, 0, j, 0)),   # logit tile
            ],
            out_specs=[
                pl.BlockSpec((1, C, 128), lambda n, j: (n, 0, 0)),          # per-batch tp
                pl.BlockSpec((1, C, 128), lambda n, j: (n, 0, 0)),          # per-batch sum(p)+sum(y)
            ],
        ),
        compiler_params=pltpu.CompilerParams(
            dimension_semantics=("parallel", "arbitrary"),
            vmem_limit_bytes=32 * 1024 * 1024,
        ),
    )(lab, xr)

    # Tiny (C,)-sized epilogue in plain JAX.
    tp = jnp.sum(tp_part, axis=(0, 2))        # (C,)
    den = jnp.sum(den_part, axis=(0, 2))      # (C,) == 2*tp + fp + fn
    dc = (2.0 * tp + smooth) / (den + smooth)
    return -(dc[0] * weight[0] + dc[1] * weight[1])


def soft_dice_loss_ref(x, y_onehot, weight, *, smooth=1.0):
    """Pure-JAX reference mirroring the PyTorch module (batch_dice, do_bg, nonlin)."""
    p = jax.nn.softmax(x.astype(jnp.float32), axis=1)
    yf = y_onehot.astype(jnp.float32)
    axes = (0, 2, 3)  # batch_dice=True -> [0] + spatial axes
    tp = jnp.sum(p * yf, axis=axes)
    fp = jnp.sum(p * (1.0 - yf), axis=axes)
    fn = jnp.sum((1.0 - p) * yf, axis=axes)
    dc = (2.0 * tp + smooth) / (2.0 * tp + fp + fn + smooth)
    return -(dc[0] * weight[0] + dc[1] * weight[1])


if __name__ == "__main__":
    key = jax.random.PRNGKey(0)
    weight = jnp.array([0.3, 0.7], dtype=jnp.float32)

    def run_case(case_key, N, C, H, W, dtype=jnp.float32, tol=2e-3, **kw):
        kx, ky = jax.random.split(case_key)
        x = jax.random.normal(kx, (N, C, H, W), dtype=jnp.float32).astype(dtype)
        labels = jax.random.randint(ky, (N, H, W), 0, C)
        y = jax.nn.one_hot(labels, C, axis=1, dtype=jnp.float32)  # reference-only
        loss = jax.block_until_ready(soft_dice_loss(x, labels, weight, smooth=1.0, **kw))
        loss_ref = soft_dice_loss_ref(x, y, weight, smooth=1.0)
        # tolerance: in-kernel softmax uses the EUP approx reciprocal.
        assert jnp.allclose(loss, loss_ref, rtol=tol, atol=tol), (loss, loss_ref)

    keys = jax.random.split(key, 4)
    run_case(keys[0], 2, 4, 16, 16)                                 # aligned, single tile
    run_case(keys[1], 1, 4, 10, 12)                                 # ragged -> padded + masked
    run_case(keys[2], 2, 4, 32, 64, max_sublane_tile=8)             # multi-tile accumulation path
    run_case(keys[3], 2, 4, 32, 64, dtype=jnp.bfloat16, tol=2e-2)   # bf16 streaming, no HBM upcast

    print("KERNEL_OK")
</pallas_src>

<mosaic_0001>
module attributes {stable_mosaic.version = 11 : i64} {
  func.func @_soft_dice_kernel(%arg0: i32, %arg1: i32, %arg2: memref<1x1x2x128xi32, #tpu.memory_space<vmem>>, %arg3: memref<1x4x2x128xf32, #tpu.memory_space<vmem>>, %arg4: memref<1x4x128xf32, #tpu.memory_space<vmem>>, %arg5: memref<1x4x128xf32, #tpu.memory_space<vmem>>) attributes {dimension_semantics = [#tpu.dimension_semantics<parallel>, #tpu.dimension_semantics<arbitrary>], iteration_bounds = array<i64: 2, 1>, scalar_prefetch = 0 : i64, scratch_operands = 0 : i64, tpu.core_type = #tpu.core_type<tc>, window_params = [{transform_indices = @transform_0, window_bounds = array<i64: 1, 1, 2, 128>}, {transform_indices = @transform_1, window_bounds = array<i64: 1, 4, 2, 128>}, {transform_indices = @transform_2, window_bounds = array<i64: 1, 4, 128>}, {transform_indices = @transform_3, window_bounds = array<i64: 1, 4, 128>}]} {
    %c0_i32 = arith.constant 0 : i32
    %0 = arith.cmpi eq, %arg1, %c0_i32 : i32
    %1 = arith.extui %0 : i1 to i32
    %c0_i32_0 = arith.constant 0 : i32
    %2 = arith.cmpi ne, %1, %c0_i32_0 : i32
    scf.if %2 {
      %cst_23 = arith.constant 0.000000e+00 : f32
      %39 = vector.broadcast %cst_23 : f32 to vector<1x4x128xf32>
      %c0_24 = arith.constant 0 : index
      %c0_25 = arith.constant 0 : index
      %c0_26 = arith.constant 0 : index
      %40 = vector.load %arg4[%c0_24, %c0_25, %c0_26] : memref<1x4x128xf32, #tpu.memory_space<vmem>>, vector<1x4x128xf32>
      tpu.vector_store %arg4[%c0_24, %c0_25, %c0_26], %39 {strides = array<i32>} : memref<1x4x128xf32, #tpu.memory_space<vmem>>, vector<1x4x128xf32>,
      %cst_27 = arith.constant 0.000000e+00 : f32
      %41 = vector.broadcast %cst_27 : f32 to vector<1x4x128xf32>
      %c0_28 = arith.constant 0 : index
      %c0_29 = arith.constant 0 : index
      %c0_30 = arith.constant 0 : index
      %42 = vector.load %arg5[%c0_28, %c0_29, %c0_30] : memref<1x4x128xf32, #tpu.memory_space<vmem>>, vector<1x4x128xf32>
      tpu.vector_store %arg5[%c0_28, %c0_29, %c0_30], %41 {strides = array<i32>} : memref<1x4x128xf32, #tpu.memory_space<vmem>>, vector<1x4x128xf32>,
    } else {
    }
    %c0 = arith.constant 0 : index
    %c0_1 = arith.constant 0 : index
    %c0_2 = arith.constant 0 : index
    %c0_3 = arith.constant 0 : index
    %3 = vector.load %arg3[%c0, %c0_1, %c0_2, %c0_3] : memref<1x4x2x128xf32, #tpu.memory_space<vmem>>, vector<1x4x2x128xf32>
    %4 = vector.shape_cast %3 : vector<1x4x2x128xf32> to vector<4x2x128xf32>
    %c0_4 = arith.constant 0 : index
    %c0_5 = arith.constant 0 : index
    %c0_6 = arith.constant 0 : index
    %c0_7 = arith.constant 0 : index
    %5 = vector.load %arg2[%c0_4, %c0_5, %c0_6, %c0_7] : memref<1x1x2x128xi32, #tpu.memory_space<vmem>>, vector<1x1x2x128xi32>
    %6 = vector.shape_cast %5 : vector<1x1x2x128xi32> to vector<2x128xi32>
    %cst = arith.constant dense<0xFF800000> : vector<2x128xf32>
    %7 = vector.multi_reduction <maximumf>, %4, %cst [0] : vector<4x2x128xf32> to vector<2x128xf32>
    %8 = vector.shape_cast %7 : vector<2x128xf32> to vector<1x2x128xf32>
    %9 = vector.broadcast %8 : vector<1x2x128xf32> to vector<4x2x128xf32>
    %10 = arith.subf %4, %9 : vector<4x2x128xf32>
    %11 = math.exp %10 : vector<4x2x128xf32>
    %cst_8 = arith.constant dense<0.000000e+00> : vector<2x128xf32>
    %12 = vector.multi_reduction <add>, %11, %cst_8 [0] : vector<4x2x128xf32> to vector<2x128xf32>
    %13 = vector.shape_cast %12 : vector<2x128xf32> to vector<1x2x128xf32>
    %14 = tpu.reciprocal %13 {approx = true} : vector<1x2x128xf32> -> vector<1x2x128xf32>
    %15 = vector.broadcast %14 : vector<1x2x128xf32> to vector<4x2x128xf32>
    %16 = arith.mulf %11, %15 : vector<4x2x128xf32>
    %17 = tpu.iota {dimensions = array<i32: 0>} : vector<4x2x128xi32>
    %18 = vector.shape_cast %6 : vector<2x128xi32> to vector<1x2x128xi32>
    %19 = vector.broadcast %18 : vector<1x2x128xi32> to vector<4x2x128xi32>
    %20 = arith.cmpi eq, %17, %19 : vector<4x2x128xi32>
    %21 = arith.extui %20 : vector<4x2x128xi1> to vector<4x2x128xi32>
    %22 = arith.sitofp %21 : vector<4x2x128xi32> to vector<4x2x128xf32>
    %c0_9 = arith.constant 0 : index
    %c0_10 = arith.constant 0 : index
    %c0_11 = arith.constant 0 : index
    %23 = vector.load %arg4[%c0_9, %c0_10, %c0_11] : memref<1x4x128xf32, #tpu.memory_space<vmem>>, vector<1x4x128xf32>
    %24 = vector.shape_cast %23 : vector<1x4x128xf32> to vector<4x128xf32>
    %25 = arith.mulf %16, %22 : vector<4x2x128xf32>
    %cst_12 = arith.constant dense<0.000000e+00> : vector<4x128xf32>
    %26 = vector.multi_reduction <add>, %25, %cst_12 [1] : vector<4x2x128xf32> to vector<4x128xf32>
    %27 = arith.addf %24, %26 : vector<4x128xf32>
    %c0_13 = arith.constant 0 : index
    %c0_14 = arith.constant 0 : index
    %c0_15 = arith.constant 0 : index
    %28 = vector.load %arg4[%c0_13, %c0_14, %c0_15] : memref<1x4x128xf32, #tpu.memory_space<vmem>>, vector<1x4x128xf32>
    %29 = vector.shape_cast %28 : vector<1x4x128xf32> to vector<4x128xf32>
    %30 = vector.shape_cast %27 : vector<4x128xf32> to vector<1x4x128xf32>
    tpu.vector_store %arg4[%c0_13, %c0_14, %c0_15], %30 {strides = array<i32>} : memref<1x4x128xf32, #tpu.memory_space<vmem>>, vector<1x4x128xf32>,
    %c0_16 = arith.constant 0 : index
    %c0_17 = arith.constant 0 : index
    %c0_18 = arith.constant 0 : index
    %31 = vector.load %arg5[%c0_16, %c0_17, %c0_18] : memref<1x4x128xf32, #tpu.memory_space<vmem>>, vector<1x4x128xf32>
    %32 = vector.shape_cast %31 : vector<1x4x128xf32> to vector<4x128xf32>
    %33 = arith.addf %16, %22 : vector<4x2x128xf32>
    %cst_19 = arith.constant dense<0.000000e+00> : vector<4x128xf32>
    %34 = vector.multi_reduction <add>, %33, %cst_19 [1] : vector<4x2x128xf32> to vector<4x128xf32>
    %35 = arith.addf %32, %34 : vector<4x128xf32>
    %c0_20 = arith.constant 0 : index
    %c0_21 = arith.constant 0 : index
    %c0_22 = arith.constant 0 : index
    %36 = vector.load %arg5[%c0_20, %c0_21, %c0_22] : memref<1x4x128xf32, #tpu.memory_space<vmem>>, vector<1x4x128xf32>
    %37 = vector.shape_cast %36 : vector<1x4x128xf32> to vector<4x128xf32>
    %38 = vector.shape_cast %35 : vector<4x128xf32> to vector<1x4x128xf32>
    tpu.vector_store %arg5[%c0_20, %c0_21, %c0_22], %38 {strides = array<i32>} : memref<1x4x128xf32, #tpu.memory_space<vmem>>, vector<1x4x128xf32>,
    return
  }
  func.func @transform_0(%arg0: i32, %arg1: i32) -> (i32, i32, i32, i32) {
    %c0_i32 = arith.constant 0 : i32
    %c0_i32_0 = arith.constant 0 : i32
    %c0_i32_1 = arith.constant 0 : i32
    return %arg0, %c0_i32, %arg1, %c0_i32_0 : i32, i32, i32, i32
  }
  func.func @transform_1(%arg0: i32, %arg1: i32) -> (i32, i32, i32, i32) {
    %c0_i32 = arith.constant 0 : i32
    %c0_i32_0 = arith.constant 0 : i32
    %c0_i32_1 = arith.constant 0 : i32
    return %arg0, %c0_i32, %arg1, %c0_i32_0 : i32, i32, i32, i32
  }
  func.func @transform_2(%arg0: i32, %arg1: i32) -> (i32, i32, i32) {
    %c0_i32 = arith.constant 0 : i32
    %c0_i32_0 = arith.constant 0 : i32
    %c0_i32_1 = arith.constant 0 : i32
    return %arg0, %c0_i32, %c0_i32_0 : i32, i32, i32
  }
  func.func @transform_3(%arg0: i32, %arg1: i32) -> (i32, i32, i32) {
    %c0_i32 = arith.constant 0 : i32
    %c0_i32_0 = arith.constant 0 : i32
    %c0_i32_1 = arith.constant 0 : i32
    return %arg0, %c0_i32, %c0_i32_0 : i32, i32, i32
  }
}

</mosaic_0001>

<bundles_post_ra>
// kernel: tpu_custom_call.1
= control target key start
LH: loop header
LB: loop body
LE: loop exit
PB: predicated region body
PF: predicated region fallthrough
CT: control target
= control target key end

     0   :  { %9 = vsyncpa [#allocation3], 0  ;;  %s1118_s0 = inlined_call_operand.hbm [shape: s32[2,1,2,128], index: 0, kind: input, shape index: {}]   ;;  %s1119_s1 = inlined_call_operand.hbm [shape: f32[2,4,2,128], index: 1, kind: input, shape index: {}]   ;;  %s1120_s2 = inlined_call_operand.hbm [shape: f32[2,4,128], index: 2, kind: output, shape index: {0}]   ;;  %s1121_s3 = inlined_call_operand.hbm [shape: f32[2,4,128], index: 3, kind: output, shape index: {1}]  }
   0x1   :  { %11 = vsyncpa [#allocation3 + $0x1], 0 }
   0x2   :  { %12 = vsyncpa [#allocation6], 0 }
   0x3   :  { %14 = vsyncpa [#allocation6 + $0x1], 0 }
   0x4   :  { %15 = vsyncpa [#allocation4], 0 }
   0x5   :  { %17 = vsyncpa [#allocation4 + $0x1], 0 }
   0x6   :  { %18 = vsyncpa [#allocation9], 0 }
   0x7   :  { %20 = vsyncpa [#allocation9 + $0x1], 0  ;;  %s876_s12 = smov 0   ;;  %s878_s13 = smov 0  }
   0x8   :  { %s880_s14 = smov 0   ;;  %s882_s15 = smov 0  }
   0x9   :  { %s884_s16 = smov 0   ;;  %s886_s17 = smov 0  }
   0xa LB: > { %s567_s18 = sadd.s32 4294967295, %s847_s17   ;;  %s568_s19 = sadd.s32 4294967294, %s847_s17   ;;  %s847_s17 = sphi %s886_s17, %s26_s17   ;;  %s843_s16 = sphi %s884_s16, %s1133_s16   ;;  %s839_s15 = sphi %s882_s15, %s1132_s15   ;;  %s835_s14 = sphi %s880_s14, %s1131_s14   ;;  %s831_s13 = sphi %s878_s13, %s1130_s13   ;;  %s827_s12 = sphi %s876_s12, %s1129_s12  }
   0xb   : > { %s38_s20 = sadd.s32 1, %s843_s16  ;;  %s47_s21 = sadd.s32 1, %s835_s14 }
   0xc   : > { %p40_p0 = scmp.ge.s32.totalorder %s38_s20, 2  ;;  %p54_p1 = scmp.ne.s32.totalorder %s835_s14, %s831_s13 }
   0xd   : > { %p55_p2 = scmp.eq.s32.totalorder %s847_s17, 0  ;;  %p60_p3 = scmp.ne.s32.totalorder %s831_s13, %s827_s12 }
   0xe   : > { %s1135_s20 = smov (%p40_p0, %s38_s20), 0  ;;  %p61_p5 = scmp.eq.s32.totalorder %s567_s18, 0 }
   0xf   : > { %p917_p4 = por %p55_p2, %p54_p1  ;;  %s42_s23 = ssub.s32 %s843_s16, %s1135_s20 }
  0x10   : > { %p112_p6 = scmp.eq.s32.totalorder %s567_s18, 1  ;;  %p45_p7 = scmp.eq.s32.totalorder %s42_s23, 0 }
  0x11   : > { %p923_p8 = por %p61_p5, %p60_p3  ;;  %p118_p10 = scmp.eq.s32.totalorder %s568_s19, 1 }
  0x12   : > { %p927_p9 = por %p112_p6, %p54_p1  ;;  %p614_p13 = scmp.lt.s32.totalorder %s847_s17, 2 }
  0x13   : > { %s932_s26 = scalar_select %p45_p7, %s835_s14, %s47_s21  }
  0x14   : > { %p934_p11 = por %p118_p10, %p60_p3  ;;  %s941_s28 = sand.u32 1, %s835_s14  }
  0x15   : > { %s571_s29 = sshll.u32 %s941_s28, 1  ;;  %s572_s30 = sshll.u32 %s843_s16, 5 }
  0x16   : > { %s174_s6 = scalar_lea.hbm %s1118_s0, %s572_s30  ;;  %s168_s7 = scalar_lea.vmem [#allocation2], %s571_s29 }
  0x17   : > { %s176_s8 = sshll.u32 %s168_s7, 4  ;;  %p950_p0 = pnand %p614_p13, %p917_p4  ;;  %s177_s8 = int_to_ptr.vmem [resolvable:$true] %s176_s8 }
  0x18   : > { %p576_p1 = scmp.ge.s32.totalorder %s847_s17, 1  ;;  %p203_p2 = scmp.lt.s32.totalorder %s847_s17, 3 }
  0x19   : > { %s165_s10 = scalar_lea.sflag [#allocation3], %s941_s28  ;;  %p679_p3 = pneg %p950_p0 }
  0x1a   : > { %s690_s11 = scalar_lea.vmem %s177_s8, 32  ;;  %s849_s18 = smov [#allocation2]  }
  0x1b   : > { %p691_p5 = scmp.ne.s32.totalorder %s177_s8, %s690_s11  ;;  %s695_s19 = sshll.u32 %s849_s18, 4  ;;  %s696_s19 = int_to_ptr.vmem [resolvable:$false] %s695_s19 }
  0x1c   : > { %s697_s21 = scalar_lea.vmem %s696_s19, 64  ;;  %p698_p4 = scmp.lt.s32.totalorder %s177_s8, %s696_s19 }
  0x1d   : > { %p693_p6 = pnand %p691_p5, %p679_p3  ;;  %p699_p10 = scmp.lt.s32.totalorder %s697_s21, %s690_s11 }
  0x1f   : > { %p694_p7 = pneg %p693_p6  ;;  %p700_p13 = por %p699_p10, %p698_p4 }
  0x21   : > { %p701_p12 = pnand %p700_p13, %p694_p7 }
  0x23   : > { %704 = shalt.err (!%p701_p12)
}
  0x24   : > { %603 = dma.hbm_to_vmem [thread:$0]  (!%p950_p0), %s174_s6, 32, %s177_s8, %s165_s10  }
  0x25   : > { %p968_p5 = pnand %p576_p1, %p203_p2  ;;  %s573_s23 = sshll.u32 %s941_s28, 3 }
  0x26   : > { %s591_s29 = sshll.u32 %s843_s16, 7  ;;  %s187_s7 = scalar_lea.vmem [#allocation5], %s573_s23 }
  0x27   : > { %s194_s5 = scalar_lea.hbm %s1119_s1, %s591_s29  ;;  %s195_s11 = sshll.u32 %s187_s7, 4  ;;  %s196_s11 = int_to_ptr.vmem [resolvable:$true] %s195_s11 }
  0x28   : > { %s184_s18 = scalar_lea.sflag [#allocation6], %s941_s28  ;;  %s718_s19 = scalar_lea.vmem %s196_s11, 128 }
  0x29   : > { %p719_p12 = scmp.ne.s32.totalorder %s196_s11, %s718_s19  ;;  %s850_s6 = smov [#allocation5]  }
  0x2a   : > { %s723_s8 = sshll.u32 %s850_s6, 4  ;;  %s724_s8 = int_to_ptr.vmem [resolvable:$false] %s723_s8 }
  0x2b   : > { %p721_p6 = pnand %p719_p12, %p679_p3  ;;  %s725_s10 = scalar_lea.vmem %s724_s8, 256 }
  0x2c   : > { %p726_p1 = scmp.lt.s32.totalorder %s196_s11, %s724_s8  ;;  %p727_p2 = scmp.lt.s32.totalorder %s725_s10, %s718_s19 }
  0x2d   : > { %p722_p7 = pneg %p721_p6 }
  0x2e   : > { %p728_p4 = por %p727_p2, %p726_p1 }
  0x30   : > { %p729_p10 = pnand %p728_p4, %p722_p7 }
  0x32   : > { %732 = shalt.err (!%p729_p10)
}
  0x33   : > { %s851_s21 = smov 32   ;;  %s852_s23 = smov 2  }
  0x34   : > { %606 = dma.hbm_to_vmem [thread:$0]  (!%p950_p0), %s194_s5, 128, %s196_s11, %s184_s18, %s851_s21, %s851_s21, %s852_s23  }
  0x35   : > { %207 = sbr.rel (%p968_p5) target bundleno = 168 (0xa8), region = 28  ;;  %s986_s28 = sand.u32 (!%p968_p5), 1, %s831_s13  }
  0x36   : > { %s577_s29 = sshll.u32 (!%p968_p5), %s986_s28, 1  ;;  %s210_s30 = scalar_lea.sflag (!%p968_p5), [#allocation3], %s986_s28 }
  0x37   : > { %s990_s4 = scalar_lea.vmem (!%p968_p5), [#allocation2], %s577_s29 }
  0x3a   : > { %810 = dma.done.wait (%p923_p8), %s210_s30, 32  }
  0x3b   : > { %812 = vsyncadd (%p923_p8), %s210_s30, 4294967264  ;;  %s578_s9 = sshll.u32 %s986_s28, 3  ;;  %s219_s22 = scalar_lea.sflag [#allocation6], %s986_s28 }
  0x3c   : > { %s222_s5 = scalar_lea.vmem [#allocation5], %s578_s9 }
  0x3d   : > { %814 = dma.done.wait (%p923_p8), %s219_s22, 128  }
  0x3e   : > { %816 = vsyncadd (%p923_p8), %s219_s22, 4294967168  ;;  %s579_s7 = sshll.u32 %s986_s28, 2  ;;  %v853_v0 = vmov 0.0   ;;  %vm266_vm0 = vcmask 1041408   ;;  %v261_v1 = vld [vmem:[%s222_s5] sm:$0x3] }
  0x3f   : > { %s1003_s11 = scalar_lea.vmem [#allocation7], %s579_s7  ;;  %s1006_s18 = scalar_lea.vmem [#allocation8], %s579_s7  ;;  %v262_v2 = vld [vmem:[%s222_s5 + $0x2] sm:$0x3]  ;;  %v263_v3 = vld [vmem:[%s222_s5 + $0x4] sm:$0x3] }
  0x40   : > { %259 = vst [vmem:[%s1003_s11] sm:$0xf] %v853_v0  ;;  %260 = vst [vmem:[%s1006_s18] sm:$0xf] %v853_v0  ;;  %v264_v4 = vld [vmem:[%s222_s5 + $0x6] sm:$0x3]  ;;  %v267_v5 = vsel %vm266_vm0, %v261_v1, -inf  ;;  %v268_v6 = vsel %vm266_vm0, %v262_v2, -inf }
  0x41   : > { %v269_v7 = vsel %vm266_vm0, %v263_v3, -inf  ;;  %v270_v8 = vsel %vm266_vm0, %v264_v4, -inf  ;;  %v271_v9 = vmax.f32 %v267_v5, %v268_v6  ;;  %v265_v31 = vld [vmem:[%s990_s4] sm:$0x3]  ;;  %vm347_vm5 = vcmask 1041409   ;;  %s587_s24 = sshll.u32 %s839_s15, 6 }
  0x42   : > { %v272_v10 = vmax.f32 %v269_v7, %v270_v8  ;;  %vm298_vm1 = vcmp.eq.s32.totalorder %v265_v31, 0  ;;  %vm299_vm2 = vcmp.eq.s32.totalorder %v265_v31, 1  ;;  %vm300_vm3 = vcmp.eq.s32.totalorder %v265_v31, 2  ;;  %s418_s19 = sshll.u32 %s1003_s11, 4  ;;  %s431_s6 = sshll.u32 %s1006_s18, 4  ;;  %s1040_s19 = int_to_ptr.vmem [resolvable:$true] %s418_s19  ;;  %s1050_s6 = int_to_ptr.vmem [resolvable:$true] %s431_s6 }
  0x43   : > { %vm301_vm4 = vcmp.eq.s32.totalorder %v265_v31, 3  ;;  %v581_v33 = vsel %vm298_vm1, 1.0, %v853_v0  ;;  %v582_v34 = vsel %vm299_vm2, 1.0, %v853_v0  ;;  %v583_v35 = vsel %vm300_vm3, 1.0, %v853_v0  ;;  %s1038_s21 = scalar_lea.hbm %s1120_s2, %s587_s24  ;;  %s1048_s29 = scalar_lea.hbm %s1121_s3, %s587_s24 }
  0x44   : > { %v273_v11 = vmax.f32 %v271_v9, %v272_v10  ;;  %v584_v36 = vsel %vm301_vm4, 1.0, %v853_v0  ;;  %vm349_vm6 = vcmask 1042434   ;;  %vm351_vm7 = vcmask 1043459   ;;  %s400_s30 = scalar_lea.sflag [#allocation4], %s986_s28  ;;  %s733_s4 = scalar_lea.vmem %s1040_s19, 64 }
  0x45   : > { %p734_p8 = scmp.ne.s32.totalorder %s1040_s19, %s733_s4  ;;  %s854_s9 = smov [#allocation7]  }
  0x46   : > { %v274_v12 = vsub.f32 %v261_v1, %v273_v11  ;;  %v275_v13 = vsub.f32 %v262_v2, %v273_v11  ;;  %v276_v14 = vsub.f32 %v263_v3, %v273_v11  ;;  %v277_v15 = vsub.f32 %v264_v4, %v273_v11  ;;  %s737_s22 = sshll.u32 %s854_s9, 4  ;;  %s738_s22 = int_to_ptr.vmem [resolvable:$false] %s737_s22 }
  0x47   : > { %p735_p0 = pnand %p734_p8, %p927_p9  ;;  %s739_s5 = scalar_lea.vmem %s738_s22, 128 }
  0x48   : > { %v278_v16 = vmul.f32 1.442695, %v274_v12  ;;  %v280_v17 = vmul.f32 1.442695, %v275_v13  ;;  %v282_v18 = vmul.f32 1.442695, %v276_v14  ;;  %p740_p13 = scmp.lt.s32.totalorder %s1040_s19, %s738_s22  ;;  %p741_p5 = scmp.lt.s32.totalorder %s739_s5, %s733_s4 }
  0x49   : > { %v284_v19 = vmul.f32 1.442695, %v277_v15  ;;  %p736_p3 = pneg %p735_p0 }
  0x4a   : > { %667 = vpow2.f32 %v278_v16  ;;  %p742_p12 = por %p741_p5, %p740_p13 }
  0x4b   : > { %669 = vpow2.f32 %v280_v17 }
  0x4c   : > { %671 = vpow2.f32 %v282_v18  ;;  %p743_p6 = pnand %p742_p12, %p736_p3 }
  0x4d   : > { %673 = vpow2.f32 %v284_v19 }
  0x57   : > { %v668_v20 = vpop.eup %667 }
  0x58   : > { %v670_v21 = vpop.eup %669  ;;  %v286_v22 = vsel %vm266_vm0, %v668_v20, 0.0 }
  0x59   : > { %v672_v23 = vpop.eup %671  ;;  %v287_v24 = vsel %vm266_vm0, %v670_v21, 0.0 }
  0x5a   : > { %v674_v25 = vpop.eup %673  ;;  %v288_v26 = vadd.f32 %v287_v24, %v286_v22  ;;  %v289_v27 = vsel %vm266_vm0, %v672_v23, 0.0 }
  0x5b   : > { %v291_v28 = vsel %vm266_vm0, %v674_v25, 0.0 }
  0x5c   : > { %v290_v29 = vadd.f32 %v289_v27, %v288_v26 }
  0x5e   : > { %v292_v30 = vadd.f32 %v291_v28, %v290_v29 }
  0x60   : > { %675 = vrcp.f32 %v292_v30 }
  0x6d   : > { %v676_v32 = vpop.eup %675 }
  0x6e   : > { %v294_v37 = vmul.f32 %v676_v32, %v668_v20  ;;  %v295_v38 = vmul.f32 %v676_v32, %v670_v21  ;;  %v296_v39 = vmul.f32 %v676_v32, %v672_v23  ;;  %v297_v40 = vmul.f32 %v676_v32, %v674_v25 }
  0x70   : > { %v311_v41 = vmul.f32 %v581_v33, %v294_v37  ;;  %v312_v42 = vmul.f32 %v582_v34, %v295_v38  ;;  %v313_v43 = vmul.f32 %v583_v35, %v296_v39  ;;  %v314_v44 = vmul.f32 %v584_v36, %v297_v40 }
  0x71   : > { %v357_v45 = vadd.f32 %v581_v33, %v294_v37  ;;  %v358_v46 = vadd.f32 %v582_v34, %v295_v38  ;;  %v359_v47 = vadd.f32 %v583_v35, %v296_v39  ;;  %v360_v48 = vadd.f32 %v584_v36, %v297_v40  ;;  %v310_v37 = vld [vmem:[%s1003_s11] sm:$0xf] }
  0x72   : > { %v315_v49 = vsel %vm266_vm0, %v311_v41, 0.0  ;;  %v322_v50 = vsel %vm266_vm0, %v312_v42, 0.0  ;;  %v329_v51 = vsel %vm266_vm0, %v313_v43, 0.0  ;;  %v336_v52 = vsel %vm266_vm0, %v314_v44, 0.0 }
  0x73   : > { %v316_v53 = vrot.slane %v315_v49, 4  ;;  %v323_v54 = vrot.slane %v322_v50, 4  ;;  %v361_v55 = vsel %vm266_vm0, %v357_v45, 0.0  ;;  %v368_v56 = vsel %vm266_vm0, %v358_v46, 0.0 }
  0x74   : > { %v362_v57 = vrot.slane %v361_v55, 4  ;;  %v369_v58 = vrot.slane %v368_v56, 4  ;;  %v330_v59 = vrot.slane %v329_v51, 4  ;;  %v337_v60 = vrot.slane %v336_v52, 4 }
  0x75   : > { %v317_v61 = vadd.f32 %v316_v53, %v315_v49  ;;  %v324_v62 = vadd.f32 %v323_v54, %v322_v50  ;;  %v375_v63 = vsel %vm266_vm0, %v359_v47, 0.0  ;;  %v382_v0 = vsel %vm266_vm0, %v360_v48, 0.0  ;;  %v356_v47 = vld [vmem:[%s1006_s18] sm:$0xf] }
  0x76   : > { %v331_v1 = vadd.f32 %v330_v59, %v329_v51  ;;  %v338_v2 = vadd.f32 %v337_v60, %v336_v52  ;;  %v363_v3 = vadd.f32 %v362_v57, %v361_v55  ;;  %v370_v4 = vadd.f32 %v369_v58, %v368_v56 }
  0x77   : > { %v318_v5 = vrot.slane %v317_v61, 2  ;;  %v325_v6 = vrot.slane %v324_v62, 2  ;;  %v376_v7 = vrot.slane %v375_v63, 4  ;;  %v383_v8 = vrot.slane %v382_v0, 4 }
  0x78   : > { %v332_v9 = vrot.slane %v331_v1, 2  ;;  %v339_v10 = vrot.slane %v338_v2, 2  ;;  %v364_v11 = vrot.slane %v363_v3, 2  ;;  %v371_v12 = vrot.slane %v370_v4, 2 }
  0x79   : > { %v319_v13 = vadd.f32 %v318_v5, %v317_v61  ;;  %v326_v14 = vadd.f32 %v325_v6, %v324_v62  ;;  %v377_v15 = vadd.f32 %v376_v7, %v375_v63  ;;  %v384_v16 = vadd.f32 %v383_v8, %v382_v0 }
  0x7a   : > { %v333_v17 = vadd.f32 %v332_v9, %v331_v1  ;;  %v340_v18 = vadd.f32 %v339_v10, %v338_v2  ;;  %v365_v19 = vadd.f32 %v364_v11, %v363_v3  ;;  %v372_v20 = vadd.f32 %v371_v12, %v370_v4 }
  0x7b   : > { %v320_v21 = vrot.slane %v319_v13, 1  ;;  %v327_v22 = vrot.slane %v326_v14, 1  ;;  %v378_v23 = vrot.slane %v377_v15, 2  ;;  %v385_v24 = vrot.slane %v384_v16, 2 }
  0x7c   : > { %v334_v25 = vrot.slane %v333_v17, 1  ;;  %v341_v26 = vrot.slane %v340_v18, 1  ;;  %v366_v27 = vrot.slane %v365_v19, 1  ;;  %v373_v28 = vrot.slane %v372_v20, 1 }
  0x7d   : > { %v321_v29 = vadd.f32 %v320_v21, %v319_v13  ;;  %v328_v30 = vadd.f32 %v327_v22, %v326_v14  ;;  %v379_v31 = vadd.f32 %v378_v23, %v377_v15  ;;  %v386_v32 = vadd.f32 %v385_v24, %v384_v16 }
  0x7e   : > { %v335_v33 = vadd.f32 %v334_v25, %v333_v17  ;;  %v342_v34 = vadd.f32 %v341_v26, %v340_v18  ;;  %v367_v35 = vadd.f32 %v366_v27, %v365_v19  ;;  %v374_v36 = vadd.f32 %v373_v28, %v372_v20 }
  0x7f   : > { %v348_v38 = vsel %vm347_vm5, %v328_v30, %v321_v29  ;;  %v380_v39 = vrot.slane %v379_v31, 1  ;;  %v387_v40 = vrot.slane %v386_v32, 1 }
  0x80   : > { %v350_v41 = vsel %vm349_vm6, %v335_v33, %v348_v38  ;;  %v393_v42 = vsel %vm347_vm5, %v374_v36, %v367_v35 }
  0x81   : > { %v352_v43 = vsel %vm351_vm7, %v342_v34, %v350_v41  ;;  %v381_v44 = vadd.f32 %v380_v39, %v379_v31  ;;  %v388_v45 = vadd.f32 %v387_v40, %v386_v32 }
  0x82   : > { %v354_v46 = vadd.f32 %v352_v43, %v310_v37 }
  0x83   : > { %v394_v48 = vsel %vm349_vm6, %v381_v44, %v393_v42 }
  0x84   : > { %355 = vst [vmem:[%s1003_s11] sm:$0xf] %v354_v46  ;;  %v395_v49 = vsel %vm351_vm7, %v388_v45, %v394_v48 }
  0x85   : > { %v397_v50 = vadd.f32 %v395_v49, %v356_v47 }
  0x86   : > { %746 = shalt.err (!%p743_p6)
}
  0x87   : > { %s747_s7 = scalar_lea.hbm %s1038_s21, 64  ;;  %s751_s8 = scalar_lea.hbm %s1120_s2, 128 }
  0x88   : > { %p748_p7 = scmp.ne.s32.totalorder %s1038_s21, %s747_s7  ;;  %p752_p4 = scmp.lt.s32.totalorder %s1038_s21, %s1120_s2 }
  0x89   : > { %p753_p10 = scmp.lt.s32.totalorder %s751_s8, %s747_s7 }
  0x8a   : > { %p749_p1 = pnand %p748_p7, %p927_p9 }
  0x8b   : > { %p754_p8 = por %p753_p10, %p752_p4 }
  0x8c   : > { %p750_p2 = pneg %p749_p1 }
  0x8e   : > { %p755_p0 = pnand %p754_p8, %p750_p2 }
  0x90   : > { %758 = shalt.err (!%p755_p0)
}
  0x91   : > { %596 = dma.vmem_to_hbm [thread:$0]  (%p927_p9), %s1040_s19, 64, %s1038_s21, %s400_s30   ;;  %398 = vst [vmem:[%s1006_s18] sm:$0xf] %v397_v50 }
  0x92   : > { %s405_s23 = scalar_lea.sflag [#allocation9], %s986_s28  ;;  %s759_s4 = scalar_lea.vmem %s1050_s6, 64 }
  0x93   : > { %p760_p3 = scmp.ne.s32.totalorder %s1050_s6, %s759_s4  ;;  %s855_s9 = smov [#allocation8]  }
  0x94   : > { %s763_s22 = sshll.u32 %s855_s9, 4  ;;  %s764_s22 = int_to_ptr.vmem [resolvable:$false] %s763_s22 }
  0x95   : > { %p761_p13 = pnand %p760_p3, %p927_p9  ;;  %s765_s5 = scalar_lea.vmem %s764_s22, 128 }
  0x96   : > { %p766_p12 = scmp.lt.s32.totalorder %s1050_s6, %s764_s22  ;;  %p767_p6 = scmp.lt.s32.totalorder %s765_s5, %s759_s4 }
  0x97   : > { %p762_p5 = pneg %p761_p13 }
  0x98   : > { %p768_p7 = por %p767_p6, %p766_p12 }
  0x9a   : > { %p769_p1 = pnand %p768_p7, %p762_p5 }
  0x9c   : > { %772 = shalt.err (!%p769_p1)
}
  0x9d   : > { %s773_s18 = scalar_lea.hbm %s1048_s29, 64  ;;  %s777_s21 = scalar_lea.hbm %s1121_s3, 128 }
  0x9e   : > { %p774_p2 = scmp.ne.s32.totalorder %s1048_s29, %s773_s18  ;;  %p778_p8 = scmp.lt.s32.totalorder %s1048_s29, %s1121_s3 }
  0x9f   : > { %p779_p0 = scmp.lt.s32.totalorder %s777_s21, %s773_s18 }
  0xa0   : > { %p775_p4 = pnand %p774_p2, %p927_p9 }
  0xa1   : > { %p780_p3 = por %p779_p0, %p778_p8 }
  0xa2   : > { %p776_p10 = pneg %p775_p4 }
  0xa4   : > { %p781_p13 = pnand %p780_p3, %p776_p10 }
  0xa6   : > { %784 = shalt.err (!%p781_p13)
}
  0xa7   : > { %597 = dma.vmem_to_hbm [thread:$0]  (%p927_p9), %s1050_s6, 64, %s1048_s29, %s405_s23  }
  0xa8 PF: > { %s443_s11 = sand.u32 1, %s827_s12   ;;  %p1128_p5 = scmp.ge.s32.totalorder %s847_s17, 2 }
  0xa9   : > { %s444_s24 = scalar_lea.sflag [#allocation4], %s443_s11 }
  0xaa   : > { %p608_p12 = pnand %p1128_p5, %p934_p11 }
  0xac   : > { %p609_p6 = pneg %p608_p12 }
  0xae   : > { %818 = dma.done.wait (%p609_p6), %s444_s24, 64  }
  0xaf   : > { %820 = vsyncadd (%p609_p6), %s444_s24, 4294967232  ;;  %s453_s8 = scalar_lea.sflag [#allocation9], %s443_s11 }
  0xb0   : > { %822 = dma.done.wait (%p609_p6), %s453_s8, 64  }
  0xb1   : > { %824 = vsyncadd (%p609_p6), %s453_s8, 4294967232  ;;  %s26_s17 = sadd.s32 1, %s847_s17   ;;  %s1129_s12 = smov %s831_s13 }
  0xb2   : > { %p23_p7 = scmp.ge.s32.totalorder %s26_s17, 4   ;;  %s1130_s13 = smov %s835_s14 }
  0xb3   : > { %s1131_s14 = smov %s932_s26  ;;  %s1132_s15 = smov %s843_s16 }
  0xb4   : > { %s1133_s16 = smov %s1135_s20  ;;  %25 = sbr.rel (!%p23_p7) target bundleno = 10 (0xa), region = 107 }
  0xb9   :  { %458 = vsyncpa [#allocation3], 1 }
  0xba   :  { %460 = vsyncpa [#allocation3 + $0x1], 1 }
  0xbb   :  { %461 = vsyncpa [#allocation6], 1 }
  0xbc   :  { %463 = vsyncpa [#allocation6 + $0x1], 1 }
  0xbd   :  { %464 = vsyncpa [#allocation4], 1 }
  0xbe   :  { %466 = vsyncpa [#allocation4 + $0x1], 1 }
  0xbf   :  { %467 = vsyncpa [#allocation9], 1 }
  0xc0   :  { %469 = vsyncpa [#allocation9 + $0x1], 1 }

</bundles_post_ra>
